<compile_context>
chip_gen: v5e
topology: v5e:2x2
jax: 0.10.0
libtpu: 0.0.40
codegen_flags: <defaults>
</compile_context>

<pallas_src>
import math
from functools import partial

import jax
import jax.numpy as jnp
from jax.experimental import pallas as pl
from jax.experimental.pallas import tpu as pltpu


def _round_up(v, m):
    return (v + m - 1) // m * m


_VMEM_CAP = None


def _vmem_cap_bytes():
    """Physical VMEM per core (fallback: 64 MiB, the smallest across v5e/v6e/v7x)."""
    global _VMEM_CAP
    if _VMEM_CAP is None:
        try:
            cap = int(pltpu.get_tpu_info().vmem_capacity_bytes)
        except Exception:
            cap = 0
        _VMEM_CAP = cap if cap > 0 else 64 * 1024 * 1024
    return _VMEM_CAP


# ---------------------------------------------------------------------------
# Kernels
# ---------------------------------------------------------------------------

def _classblock_kernel(x_ref, w1_ref, b1_ref, w2_ref, b2_ref, out_ref):
    """Resident-w2 path: matmul -> bias -> bf16 cast -> matmul -> bias."""
    h = jnp.dot(x_ref[...], w1_ref[...], preferred_element_type=jnp.float32) + b1_ref[...]
    # relu=False -> no LeakyReLU; eval-mode Dropout is identity; BN folded into w1/b1.
    f = h.astype(jnp.bfloat16)
    out = jnp.dot(f, w2_ref[...], preferred_element_type=jnp.float32) + b2_ref[...]
    out_ref[...] = out.astype(out_ref.dtype)


def _classblock_kernel_ctiled(x_ref, w1_ref, b1_ref, w2_ref, b2_ref, out_ref, h_ref):
    """Class-tiled path: h computed once per row tile, reused across class tiles."""
    @pl.when(pl.program_id(1) == 0)
    def _():
        h = jnp.dot(x_ref[...], w1_ref[...], preferred_element_type=jnp.float32) + b1_ref[...]
        h_ref[...] = h.astype(jnp.bfloat16)

    out = jnp.dot(h_ref[...], w2_ref[...], preferred_element_type=jnp.float32) + b2_ref[...]
    out_ref[...] = out.astype(out_ref.dtype)


# ---------------------------------------------------------------------------
# Forward wrapper
# ---------------------------------------------------------------------------

@partial(jax.jit, static_argnames=("class_num", "block_n", "block_c",
                                   "w2_resident_limit_bytes", "force_tile_c"))
def _class_block_impl(x, w1, b1, w2, b2, *, class_num, block_n, block_c,
                      w2_resident_limit_bytes, force_tile_c):
    N, D = x.shape
    D_pad, L_pad = w1.shape
    C_pad = w2.shape[1]

    # Row tile: >= 16 (bf16 sublane packing), prefer 128-multiples for MXU M occupancy,
    # capped at block_n.  (block_n can be raised to 1024-2048 on v5e/v6e's 128 MiB VMEM.)
    if N <= 128:
        tn = _round_up(max(N, 1), 16)
    else:
        tn = min(_round_up(block_n, 128), _round_up(N, 128))

    # Pad batch rows only to a multiple of 16 and columns only when input_dim is not
    # lane-aligned.  The ragged last row tile is handled by Pallas block padding; the
    # padded rows are sliced off below.  Padded columns multiply zero weight rows.
    n_pad = _round_up(N, 16)
    xb = x.astype(jnp.bfloat16)
    if n_pad != N or D_pad != D:
        xb = jnp.pad(xb, ((0, n_pad - N), (0, D_pad - D)))

    n_row_blocks = pl.cdiv(n_pad, tn)

    w2_bytes = L_pad * C_pad * 2
    tile_c = bool(force_tile_c) or (w2_bytes > w2_resident_limit_bytes)

    flops = 2 * n_pad * (D_pad * L_pad + L_pad * C_pad)
    bytes_accessed = (n_pad * D_pad * 2 + w1.size * 2 + w2.size * 2
                      + b1.size * 4 + b2.size * 4 + n_pad * C_pad * 4)
    cost = pl.CostEstimate(flops=flops, transcendentals=0,
                           bytes_accessed=bytes_accessed)
    vmem_cap = _vmem_cap_bytes()

    if not tile_c:
        # w2 small enough to stay VMEM-resident (single-buffered).
        vmem_plan = (2 * tn * D_pad * 2          # x tiles (bf16, double-buffered)
                     + 2 * tn * C_pad * 4        # out tiles (f32, double-buffered)
                     + D_pad * L_pad * 2         # w1 (bf16, single-buffered, resident)
                     + L_pad * C_pad * 2         # w2 (bf16, single-buffered, resident)
                     + (L_pad + C_pad) * 4)      # biases (f32, single-buffered)
        vmem_limit = int(min(vmem_cap * 3 // 4,
                             max(32 * 1024 * 1024, vmem_plan + (4 << 20))))

        out_p = pl.pallas_call(
            _classblock_kernel,
            out_shape=jax.ShapeDtypeStruct((n_pad, C_pad), jnp.float32),
            grid=(n_row_blocks,),
            in_specs=[
                pl.BlockSpec((tn, D_pad), lambda i: (i, 0)),            # x: tiled over batch
                pl.BlockSpec((D_pad, L_pad), lambda i: (0, 0),
                             pipeline_mode=pl.Buffered(1)),             # w1: resident
                pl.BlockSpec((1, L_pad), lambda i: (0, 0),
                             pipeline_mode=pl.Buffered(1)),             # b1: resident
                pl.BlockSpec((L_pad, C_pad), lambda i: (0, 0),
                             pipeline_mode=pl.Buffered(1)),             # w2: resident
                pl.BlockSpec((1, C_pad), lambda i: (0, 0),
                             pipeline_mode=pl.Buffered(1)),             # b2: resident
            ],
            out_specs=pl.BlockSpec((tn, C_pad), lambda i: (i, 0)),
            compiler_params=pltpu.CompilerParams(
                dimension_semantics=("parallel",),
                vmem_limit_bytes=vmem_limit),
            cost_estimate=cost,
        )(xb, w1, b1, w2, b2)
    else:
        # Large class head: tile w2 / out over class columns (inner "arbitrary" axis),
        # compute h once per row tile into a VMEM scratch and reuse it across C tiles.
        tc = min(_round_up(block_c, 128), C_pad)
        n_c_blocks = pl.cdiv(C_pad, tc)
        vmem_plan = (2 * tn * D_pad * 2                  # x tiles (double-buffered)
                     + 2 * tn * tc * 4                   # out tiles (double-buffered)
                     + D_pad * L_pad * 2 + L_pad * 4     # w1 / b1 (single, resident)
                     + 2 * (L_pad * tc * 2 + tc * 4)     # w2 / b2 tiles (double-buffered)
                     + tn * L_pad * 2)                   # h scratch (bf16)
        vmem_limit = int(min(vmem_cap * 3 // 4,
                             max(32 * 1024 * 1024, vmem_plan + (4 << 20))))

        out_p = pl.pallas_call(
            _classblock_kernel_ctiled,
            out_shape=jax.ShapeDtypeStruct((n_pad, C_pad), jnp.float32),
            grid=(n_row_blocks, n_c_blocks),
            in_specs=[
                pl.BlockSpec((tn, D_pad), lambda i, j: (i, 0)),         # x: constant over j
                pl.BlockSpec((D_pad, L_pad), lambda i, j: (0, 0),
                             pipeline_mode=pl.Buffered(1)),             # w1: resident
                pl.BlockSpec((1, L_pad), lambda i, j: (0, 0),
                             pipeline_mode=pl.Buffered(1)),             # b1: resident
                pl.BlockSpec((L_pad, tc), lambda i, j: (0, j)),         # w2: tiled over C
                pl.BlockSpec((1, tc), lambda i, j: (0, j)),             # b2: tiled over C
            ],
            out_specs=pl.BlockSpec((tn, tc), lambda i, j: (i, j)),
            scratch_shapes=[pltpu.VMEM((tn, L_pad), jnp.bfloat16)],
            compiler_params=pltpu.CompilerParams(
                dimension_semantics=("parallel", "arbitrary"),
                vmem_limit_bytes=vmem_limit),
            cost_estimate=cost,
        )(xb, w1, b1, w2, b2)

    return out_p[:N, :class_num]


def class_block_forward(x, prepared, *, block_n=512, block_c=512,
                        w2_resident_limit_bytes=4 * 1024 * 1024,
                        force_tile_c=False):
    """x: [N, input_dim] float32 -> [N, class_num] float32 (eval-mode ClassBlock)."""
    assert x.shape[1] == prepared["input_dim"]
    return _class_block_impl(
        x, prepared["w1"], prepared["b1"], prepared["w2"], prepared["b2"],
        class_num=prepared["class_num"], block_n=block_n, block_c=block_c,
        w2_resident_limit_bytes=w2_resident_limit_bytes, force_tile_c=force_tile_c)


# ---------------------------------------------------------------------------
# Parameter construction (PyTorch-equivalent init) and references
# ---------------------------------------------------------------------------

def init_raw_params(key, input_dim, linear, class_num):
    """PyTorch-equivalent parameters (weights_init_kaiming / weights_init_classifier)."""
    k1, k2, k3 = jax.random.split(key, 3)

    # nn.Linear(input_dim, linear): kaiming_normal_(a=0, mode='fan_out'); fan_out = linear.
    std1 = math.sqrt(2.0) / math.sqrt(linear)
    w1 = (jax.random.normal(k1, (linear, input_dim), jnp.float32) * std1).T  # [D, L]
    b1 = jnp.zeros((linear,), jnp.float32)

    # BatchNorm1d(linear): gamma ~ N(1, 0.02), beta = 0, running stats (0, 1).
    gamma = 1.0 + 0.02 * jax.random.normal(k2, (linear,), jnp.float32)
    beta = jnp.zeros((linear,), jnp.float32)
    running_mean = jnp.zeros((linear,), jnp.float32)
    running_var = jnp.ones((linear,), jnp.float32)

    # classifier nn.Linear(linear, class_num): normal_(std=0.001), bias = 0.
    w2 = (0.001 * jax.random.normal(k3, (class_num, linear), jnp.float32)).T  # [L, C]
    b2 = jnp.zeros((class_num,), jnp.float32)

    return dict(w1=w1, b1=b1, gamma=gamma, beta=beta,
                running_mean=running_mean, running_var=running_var, eps=1e-5,
                w2=w2, b2=b2)


def prepare_params(raw):
    """Fold eval-mode BN into the first Linear, pad to 128 lanes, cast weights to bf16."""
    w1, b1, w2, b2 = raw["w1"], raw["b1"], raw["w2"], raw["b2"]
    D, L = w1.shape
    C = w2.shape[1]

    scale = raw["gamma"] / jnp.sqrt(raw["running_var"] + raw["eps"])
    shift = raw["beta"] - raw["running_mean"] * scale
    w1_eff = w1 * scale[None, :]
    b1_eff = b1 * scale + shift

    D_pad, L_pad, C_pad = _round_up(D, 128), _round_up(L, 128), _round_up(C, 128)
    w1_p = jnp.zeros((D_pad, L_pad), jnp.bfloat16).at[:D, :L].set(w1_eff.astype(jnp.bfloat16))
    b1_p = jnp.zeros((1, L_pad), jnp.float32).at[0, :L].set(b1_eff)
    w2_p = jnp.zeros((L_pad, C_pad), jnp.bfloat16).at[:L, :C].set(w2.astype(jnp.bfloat16))
    b2_p = jnp.zeros((1, C_pad), jnp.float32).at[0, :C].set(b2)

    return dict(w1=w1_p, b1=b1_p, w2=w2_p, b2=b2_p, class_num=C, input_dim=D)


def reference_forward_f32(x, raw):
    """Pure-JAX f32 reference of the PyTorch eval-mode forward."""
    h = x @ raw["w1"] + raw["b1"]
    f = ((h - raw["running_mean"]) / jnp.sqrt(raw["running_var"] + raw["eps"])
         * raw["gamma"] + raw["beta"])
    return f @ raw["w2"] + raw["b2"]


def reference_forward_bf16(x, prepared):
    """Pure-JAX reference using the same folded/padded bf16 params as the kernel."""
    D = prepared["input_dim"]
    D_pad = prepared["w1"].shape[0]
    x_p = jnp.zeros((x.shape[0], D_pad), jnp.bfloat16).at[:, :D].set(x.astype(jnp.bfloat16))
    h = jnp.dot(x_p, prepared["w1"], preferred_element_type=jnp.float32) + prepared["b1"]
    out = (jnp.dot(h.astype(jnp.bfloat16), prepared["w2"],
                   preferred_element_type=jnp.float32) + prepared["b2"])
    return out[:, :prepared["class_num"]]


# ---------------------------------------------------------------------------
# Self-test
# ---------------------------------------------------------------------------

if __name__ == "__main__":
    key = jax.random.PRNGKey(0)
    k_a_x, k_a_p, k_b_x, k_b_p, k_c_x = jax.random.split(key, 5)

    def check(out, x, raw, prepared, tag):
        ref_bf16 = reference_forward_bf16(x, prepared)
        ref_f32 = reference_forward_f32(x, raw)
        assert out.shape == ref_f32.shape, tag
        assert jnp.allclose(out, ref_bf16, atol=5e-4, rtol=1e-2), f"{tag}: mismatch vs bf16 ref"
        assert jnp.allclose(out, ref_f32, atol=1e-2, rtol=5e-2), f"{tag}: mismatch vs f32 ref"

    # Config A: resident-w2 path. batch=8, input_dim=64, linear=32, class_num=16.
    raw_a = init_raw_params(k_a_p, 64, 32, 16)
    prep_a = prepare_params(raw_a)
    x_a = jax.random.normal(k_a_x, (8, 64), jnp.float32)
    out_a = jax.block_until_ready(class_block_forward(x_a, prep_a))
    check(out_a, x_a, raw_a, prep_a, "config_a")

    # Config B: class-tiled path (2 C tiles). batch=32, input_dim=64, linear=96, class_num=200.
    raw_b = init_raw_params(k_b_p, 64, 96, 200)
    prep_b = prepare_params(raw_b)
    x_b = jax.random.normal(k_b_x, (32, 64), jnp.float32)
    out_b_tiled = jax.block_until_ready(
        class_block_forward(x_b, prep_b, block_c=128, force_tile_c=True))
    out_b_res = jax.block_until_ready(class_block_forward(x_b, prep_b))
    check(out_b_tiled, x_b, raw_b, prep_b, "config_b_tiled")
    check(out_b_res, x_b, raw_b, prep_b, "config_b_resident")
    assert jnp.allclose(out_b_tiled, out_b_res, atol=1e-6), "tiled vs resident mismatch"

    # Config C: ragged multi-row-tile path (2 row tiles, last partial). batch=200.
    x_c = jax.random.normal(k_c_x, (200, 64), jnp.float32)
    out_c = jax.block_until_ready(class_block_forward(x_c, prep_a, block_n=128))
    check(out_c, x_c, raw_a, prep_a, "config_c")

    # TODO(synk): training-mode BatchNorm1d (batch statistics), Dropout masking, and
    # return_f=True are not implemented; this kernel reproduces eval-mode forward semantics.
    print("KERNEL_OK")
</pallas_src>

<mosaic_0001>
module attributes {stable_mosaic.version = 11 : i64} {
  func.func @_classblock_kernel(%arg0: i32, %arg1: memref<16x128xbf16, #tpu.memory_space<vmem>>, %arg2: memref<128x128xbf16, #tpu.memory_space<vmem>>, %arg3: memref<1x128xf32, #tpu.memory_space<vmem>>, %arg4: memref<128x128xbf16, #tpu.memory_space<vmem>>, %arg5: memref<1x128xf32, #tpu.memory_space<vmem>>, %arg6: memref<16x128xf32, #tpu.memory_space<vmem>>) attributes {dimension_semantics = [#tpu.dimension_semantics<parallel>], iteration_bounds = array<i64: 1>, scalar_prefetch = 0 : i64, scratch_operands = 0 : i64, tpu.core_type = #tpu.core_type<tc>, window_params = [{transform_indices = @transform_0, window_bounds = array<i64: 16, 128>}, {pipeline_mode = #tpu.pipeline_mode<synchronous>, transform_indices = @transform_1, window_bounds = array<i64: 128, 128>}, {pipeline_mode = #tpu.pipeline_mode<synchronous>, transform_indices = @transform_2, window_bounds = array<i64: 1, 128>}, {pipeline_mode = #tpu.pipeline_mode<synchronous>, transform_indices = @transform_3, window_bounds = array<i64: 128, 128>}, {pipeline_mode = #tpu.pipeline_mode<synchronous>, transform_indices = @transform_4, window_bounds = array<i64: 1, 128>}, {transform_indices = @transform_5, window_bounds = array<i64: 16, 128>}]} {
    %c0 = arith.constant 0 : index
    %c0_0 = arith.constant 0 : index
    %0 = vector.load %arg1[%c0, %c0_0] : memref<16x128xbf16, #tpu.memory_space<vmem>>, vector<16x128xbf16>
    %c0_1 = arith.constant 0 : index
    %c0_2 = arith.constant 0 : index
    %1 = vector.load %arg2[%c0_1, %c0_2] : memref<128x128xbf16, #tpu.memory_space<vmem>>, vector<128x128xbf16>
    %cst = arith.constant dense<0.000000e+00> : vector<16x128xf32>
    %2 = tpu.matmul %0, %1, %cst {dimension_numbers = #tpu.dot_dimension_numbers<[1], [0], [0], [1], [0, 0, 1, 1], [], []>} : vector<16x128xbf16>, vector<128x128xbf16>, vector<16x128xf32> -> vector<16x128xf32>
    %c0_3 = arith.constant 0 : index
    %c0_4 = arith.constant 0 : index
    %3 = vector.load %arg3[%c0_3, %c0_4] : memref<1x128xf32, #tpu.memory_space<vmem>>, vector<1x128xf32>
    %4 = vector.broadcast %3 : vector<1x128xf32> to vector<16x128xf32>
    %5 = arith.addf %2, %4 : vector<16x128xf32>
    %6 = arith.truncf %5 : vector<16x128xf32> to vector<16x128xbf16>
    %c0_5 = arith.constant 0 : index
    %c0_6 = arith.constant 0 : index
    %7 = vector.load %arg4[%c0_5, %c0_6] : memref<128x128xbf16, #tpu.memory_space<vmem>>, vector<128x128xbf16>
    %cst_7 = arith.constant dense<0.000000e+00> : vector<16x128xf32>
    %8 = tpu.matmul %6, %7, %cst_7 {dimension_numbers = #tpu.dot_dimension_numbers<[1], [0], [0], [1], [0, 0, 1, 1], [], []>} : vector<16x128xbf16>, vector<128x128xbf16>, vector<16x128xf32> -> vector<16x128xf32>
    %c0_8 = arith.constant 0 : index
    %c0_9 = arith.constant 0 : index
    %9 = vector.load %arg5[%c0_8, %c0_9] : memref<1x128xf32, #tpu.memory_space<vmem>>, vector<1x128xf32>
    %10 = vector.broadcast %9 : vector<1x128xf32> to vector<16x128xf32>
    %11 = arith.addf %8, %10 : vector<16x128xf32>
    %c0_10 = arith.constant 0 : index
    %c0_11 = arith.constant 0 : index
    %12 = vector.load %arg6[%c0_10, %c0_11] : memref<16x128xf32, #tpu.memory_space<vmem>>, vector<16x128xf32>
    tpu.vector_store %arg6[%c0_10, %c0_11], %11 {strides = array<i32>} : memref<16x128xf32, #tpu.memory_space<vmem>>, vector<16x128xf32>,
    return
  }
  func.func @transform_0(%arg0: i32) -> (i32, i32) {
    %c0_i32 = arith.constant 0 : i32
    %c0_i32_0 = arith.constant 0 : i32
    return %arg0, %c0_i32 : i32, i32
  }
  func.func @transform_1(%arg0: i32) -> (i32, i32) {
    %c0_i32 = arith.constant 0 : i32
    %c0_i32_0 = arith.constant 0 : i32
    %c0_i32_1 = arith.constant 0 : i32
    return %c0_i32, %c0_i32_0 : i32, i32
  }
  func.func @transform_2(%arg0: i32) -> (i32, i32) {
    %c0_i32 = arith.constant 0 : i32
    %c0_i32_0 = arith.constant 0 : i32
    %c0_i32_1 = arith.constant 0 : i32
    return %c0_i32, %c0_i32_0 : i32, i32
  }
  func.func @transform_3(%arg0: i32) -> (i32, i32) {
    %c0_i32 = arith.constant 0 : i32
    %c0_i32_0 = arith.constant 0 : i32
    %c0_i32_1 = arith.constant 0 : i32
    return %c0_i32, %c0_i32_0 : i32, i32
  }
  func.func @transform_4(%arg0: i32) -> (i32, i32) {
    %c0_i32 = arith.constant 0 : i32
    %c0_i32_0 = arith.constant 0 : i32
    %c0_i32_1 = arith.constant 0 : i32
    return %c0_i32, %c0_i32_0 : i32, i32
  }
  func.func @transform_5(%arg0: i32) -> (i32, i32) {
    %c0_i32 = arith.constant 0 : i32
    %c0_i32_0 = arith.constant 0 : i32
    return %arg0, %c0_i32 : i32, i32
  }
}

</mosaic_0001>

<bundles_post_ra>
// kernel: _class_block_impl.1
= control target key start
LH: loop header
LB: loop body
LE: loop exit
PB: predicated region body
PF: predicated region fallthrough
CT: control target
= control target key end

     0   :  { %10 = vsyncpa [#allocation3], 0  ;;  %s431_s0 = inlined_call_operand.vmem [shape: bf16[16,128], index: 0, kind: input, shape index: {}]   ;;  %s432_s1 = inlined_call_operand.hbm [shape: bf16[128,128], index: 1, kind: input, shape index: {}]   ;;  %s433_s2 = inlined_call_operand.vmem [shape: f32[1,128], index: 2, kind: input, shape index: {}]   ;;  %s434_s3 = inlined_call_operand.hbm [shape: bf16[128,128], index: 3, kind: input, shape index: {}]   ;;  %s435_s4 = inlined_call_operand.vmem [shape: f32[1,128], index: 4, kind: input, shape index: {}]   ;;  %s436_s5 = inlined_call_operand.vmem [shape: f32[16,128], index: 5, kind: output, shape index: {}]  }
   0x1   :  { %s18_s20 = sshll.u32 %s432_s1, 4  ;;  %s19_s20 = int_to_ptr.hbm [resolvable:$true] %s18_s20 }
   0x2   :  { %11 = vsyncpa [#allocation5], 0  ;;  %s376_s21 = smov [#allocation2]   ;;  %s33_s25 = sshll.u32 %s434_s3, 4  ;;  %s34_s25 = int_to_ptr.hbm [resolvable:$true] %s33_s25 }
   0x3   :  { %s20_s22 = sshll.u32 %s376_s21, 4  ;;  %s377_s26 = smov 64   ;;  %s21_s22 = int_to_ptr.vmem [resolvable:$true] %s20_s22 }
   0x4   :  { %s378_s27 = smov 4   ;;  %s379_s28 = smov [#allocation4]  }
   0x5   :  { %26 = dma.hbm_to_vmem [thread:$0]  %s19_s20, 1024, %s21_s22, [#allocation3], %s377_s26, %s377_s26, %s378_s27  }
   0x6   :  { %s35_s29 = sshll.u32 %s379_s28, 4  ;;  %s36_s29 = int_to_ptr.vmem [resolvable:$true] %s35_s29 }
   0x7   :  { %41 = dma.hbm_to_vmem [thread:$0]  %s34_s25, 1024, %s36_s29, [#allocation5], %s377_s26, %s377_s26, %s378_s27  }
   0x8   :  { %372 = dma.done.wait [#allocation3], 1024  }
   0x9   :  { %373 = vsyncadd [#allocation3], 4294966272 }
   0xa   :  { %374 = dma.done.wait [#allocation5], 1024  }
   0xb   :  { %375 = vsyncadd [#allocation5], 4294966272  ;;  %v309_v0 = vld [vmem:[#allocation2 + $0x38] sm:$0xff]  ;;  %v308_v1 = vld [vmem:[#allocation2 + $0x30] sm:$0xff] }
   0xc   :  { %128 = vmatpush.bf16.msra.mxu0 %v309_v0  ;;  %v317_v2 = vld [vmem:[#allocation4 + $0x38] sm:$0xff]  ;;  %v316_v3 = vld [vmem:[#allocation4 + $0x30] sm:$0xff]  ;;  %v307_v4 = vld [vmem:[#allocation2 + $0x28] sm:$0xff] }
   0xd   :  { %211 = vmatpush.bf16.msra.mxu1 %v317_v2  ;;  %v315_v5 = vld [vmem:[#allocation4 + $0x28] sm:$0xff]  ;;  %v306_v6 = vld [vmem:[#allocation2 + $0x20] sm:$0xff]  ;;  %v305_v8 = vld [vmem:[#allocation2 + $0x18] sm:$0xff] }
   0xe   :  { %v314_v7 = vld [vmem:[#allocation4 + $0x20] sm:$0xff]  ;;  %v313_v9 = vld [vmem:[#allocation4 + $0x18] sm:$0xff]  ;;  %v304_v10 = vld [vmem:[#allocation2 + $0x10] sm:$0xff] }
   0xf   :  { %v303_v11 = vld [vmem:[#allocation2 + $0x8] sm:$0xff]  ;;  %v302_v12 = vld [vmem:[#allocation2] sm:$0xff]  ;;  %v312_v14 = vld [vmem:[#allocation4 + $0x10] sm:$0xff] }
  0x10   :  { %129 = vmatpush.bf16.msra.mxu0 %v308_v1  ;;  %v301_v13 = vld [vmem:[%s431_s0] sm:$0xff]  ;;  %v311_v15 = vld [vmem:[#allocation4 + $0x8] sm:$0xff] }
  0x11   :  { %212 = vmatpush.bf16.msra.mxu1 %v316_v3  ;;  %v310_v16 = vld [vmem:[#allocation4] sm:$0xff] }
  0x12   :  { %v322_v18 = vld [vmem:[%s433_s2] ss:$0 sm:$0xff] }
  0x13   :  { %v323_v23 = vld [vmem:[%s435_s4] ss:$0 sm:$0xff] }
  0x14   :  { %130 = vmatpush.bf16.msra.mxu0 %v307_v4 }
  0x15   :  { %213 = vmatpush.bf16.msra.mxu1 %v315_v5 }
  0x18   :  { %131 = vmatpush.bf16.msra.mxu0 %v306_v6 }
  0x19   :  { %214 = vmatpush.bf16.msra.mxu1 %v314_v7 }
  0x1c   :  { %132 = vmatpush.bf16.msra.mxu0 %v305_v8 }
  0x1d   :  { %215 = vmatpush.bf16.msra.mxu1 %v313_v9 }
  0x20   :  { %133 = vmatpush.bf16.msra.mxu0 %v304_v10 }
  0x21   :  { %216 = vmatpush.bf16.msra.mxu1 %v312_v14 }
  0x24   :  { %134 = vmatpush.bf16.msra.mxu0 %v303_v11 }
  0x25   :  { %217 = vmatpush.bf16.msra.mxu1 %v311_v15 }
  0x28   :  { %135 = vmatpush.bf16.msra.mxu0 %v302_v12 }
  0x29   :  { %218 = vmatpush.bf16.msra.mxu1 %v310_v16 }
  0x2b   :  { %136 = vmatmul.bf16.vlgmr.msra.gmra.mxu0 %v301_v13 }
  0xa8   :  { %v137_v17 = vpop.f32.mrf.mxu0 }
  0xa9   :  { %v138_v20 = vadd.f32 %v322_v18, %v137_v17 }
  0xb0   :  { %v139_v19 = vpop.f32.mrf.mxu0 }
  0xb1   :  { %v140_v21 = vadd.f32 %v322_v18, %v139_v19 }
  0xb3   :  { %v142_v22 = vpack.c.bf16 %v140_v21, %v138_v20 }
  0xb5   :  { %219 = vmatmul.bf16.vlgmr.msra.gmra.mxu1 %v142_v22 }
 0x132   :  { %v220_v24 = vpop.f32.mrf.mxu1 }
 0x133   :  { %v221_v25 = vadd.f32 %v323_v23, %v220_v24 }
 0x135   :  { %225 = vst [vmem:[%s436_s5] sm:$0xff] %v221_v25 }
 0x13a   :  { %v222_v26 = vpop.f32.mrf.mxu1 }
 0x13b   :  { %v223_v27 = vadd.f32 %v323_v23, %v222_v26 }
 0x13d   :  { %226 = vst [vmem:[%s436_s5 + $0x8] sm:$0xff] %v223_v27 }
 0x13e   :  { %231 = vsyncpa [#allocation3], 1 }
 0x13f   :  { %232 = vsyncpa [#allocation5], 1 }

</bundles_post_ra>
